<compile_context>
chip_gen: v6e
topology: v6e:2x2x1
jax: 0.10.0
libtpu: 0.0.40
codegen_flags: <defaults>
</compile_context>

<pallas_src>
import functools

import jax
import jax.numpy as jnp
from jax.experimental import pallas as pl
from jax.experimental.pallas import tpu as pltpu

STATE_DIM = 13
STATE_DIM_PAD = 16        # K padded to a clean multiple of 8 (row 13 = bias)
HIDDEN_DIM = 128
HEAD_HIDDEN = 256         # 64 + 64 + 32 + 32 + 64 (fused head hidden width)
OUT_WIDTH = 128           # lane-dense output slab width
# output-slab column layout: [0:3) model | [3:6) intensity | [6:8) binary
#                            [8:9) confidence | [9:10) value | [10:128) pad


# ----------------------------------------------------------------------------
# Kernel
# ----------------------------------------------------------------------------
def _policy_kernel(x_ref,
                   w1_ref, w2_ref, b2_ref, w3_ref, b3_ref,
                   wh1_ref, bh1_ref, wh2_ref, bh2_ref,
                   masks_ref, gsum_ref,
                   out_ref):
    def linear(h, w_ref, b_ref):
        w = w_ref[...]
        return (jnp.dot(h.astype(w.dtype), w, preferred_element_type=jnp.float32)
                + b_ref[...].astype(jnp.float32))

    def relu(h):
        return jnp.maximum(h, 0.0)

    # ---- feature extractor: (Linear -> ReLU -> Dropout(eval: no-op)) x 3 ----
    # First layer: bias folded into row 13 of w1 (x[:, 13] == 1), so no add.
    x = x_ref[...]                                            # [TB, 16] f32
    h = relu(jnp.dot(x.astype(w1_ref.dtype), w1_ref[...],
                     preferred_element_type=jnp.float32))     # [TB, 128]
    h = relu(linear(h, w2_ref, b2_ref))                       # [TB, 128]
    h = relu(linear(h, w3_ref, b3_ref))                       # [TB, 128]

    # ---- fused heads: one full-width pass each ----
    z = relu(linear(h, wh1_ref, bh1_ref))                     # [TB, 256]
    logits = linear(z, wh2_ref, bh2_ref)                      # [TB, 128]

    # ---- epilogue on the lane-dense slab (constant mask rows, one exp) ----
    g0 = masks_ref[0:1, :]     # 1 on model-softmax cols 0..2
    g1 = masks_ref[1:2, :]     # 1 on intensity-softmax cols 3..5
    grp = masks_ref[2:3, :]    # union of the two softmax groups
    sigm = masks_ref[3:4, :]   # 1 on sigmoid cols 6..8 (binary + confidence)
    valm = masks_ref[4:5, :]   # 1 on value col 9
    pm = masks_ref[5:6, :]     # +1 on softmax cols, -1 on sigmoid cols, 0 else
    ngrp = masks_ref[6:7, :]   # 1 - grp

    neg_big = jnp.float32(-1e30)
    m0 = jnp.max(jnp.where(g0 > 0, logits, neg_big), axis=-1, keepdims=True)
    m1 = jnp.max(jnp.where(g1 > 0, logits, neg_big), axis=-1, keepdims=True)
    shift = g0 * m0 + g1 * m1                 # per-group max, zero elsewhere

    # single exp: softmax numerators on group cols, exp(-x) on sigmoid cols,
    # exp(0)=1 on all other cols (harmless).
    e = jnp.exp(pm * logits - shift)          # [TB, 128]
    eg = grp * e                              # masked softmax numerators

    # group sums via indicator matmul on the MXU, broadcast across group cols
    gsum = jnp.dot(eg.astype(gsum_ref.dtype), gsum_ref[...],
                   preferred_element_type=jnp.float32)

    # softmax cols: eg / sum ; sigmoid cols: 1 / (1 + exp(-x))
    # value col:    logits / 1 ; pad cols:    0 / 1
    numer = eg + sigm + valm * logits
    denom = gsum + sigm * e + ngrp
    out_ref[...] = (numer / denom).astype(out_ref.dtype)   # single lane-dense store


# ----------------------------------------------------------------------------
# Parameter construction (PyTorch-default-style uniform init, W as (in, out))
# ----------------------------------------------------------------------------
def _init_linear(key, fan_in, fan_out):
    kw, kb = jax.random.split(key)
    bound = 1.0 / jnp.sqrt(jnp.float32(fan_in))
    w = jax.random.uniform(kw, (fan_in, fan_out), jnp.float32, -bound, bound)
    b = jax.random.uniform(kb, (1, fan_out), jnp.float32, -bound, bound)
    return w, b


def init_policy_params(key):
    keys = jax.random.split(key, 13)
    p = []
    p += _init_linear(keys[0], STATE_DIM, HIDDEN_DIM)
    p += _init_linear(keys[1], HIDDEN_DIM, HIDDEN_DIM)
    p += _init_linear(keys[2], HIDDEN_DIM, HIDDEN_DIM)
    p += _init_linear(keys[3], HIDDEN_DIM, 64)   # model head
    p += _init_linear(keys[4], 64, 3)
    p += _init_linear(keys[5], HIDDEN_DIM, 64)   # intensity head
    p += _init_linear(keys[6], 64, 3)
    p += _init_linear(keys[7], HIDDEN_DIM, 32)   # binary decisions head
    p += _init_linear(keys[8], 32, 2)
    p += _init_linear(keys[9], HIDDEN_DIM, 32)   # confidence head
    p += _init_linear(keys[10], 32, 1)
    p += _init_linear(keys[11], HIDDEN_DIM, 64)  # value head
    p += _init_linear(keys[12], 64, 1)
    return tuple(p)


def fuse_params(params, param_dtype=jnp.bfloat16):
    """Fuse per-layer parameters into the kernel's fused/padded layout.

    Weights default to bf16 (bf16-native MXU on v5e/v6e/v7x; f32 accumulation
    is kept in-kernel). Biases and mask constants stay f32.
    """
    (w1, b1, w2, b2, w3, b3,
     wm1, bm1, wm2, bm2,
     wi1, bi1, wi2, bi2,
     wb1, bb1, wb2, bb2,
     wc1, bc1, wc2, bc2,
     wv1, bv1, wv2, bv2) = params

    # first layer: contraction padded 13 -> 16; bias folded into row 13
    # (the wrapper sets x[:, 13] = 1).
    w1p = jnp.zeros((STATE_DIM_PAD, HIDDEN_DIM), jnp.float32)
    w1p = w1p.at[:STATE_DIM].set(w1).at[STATE_DIM].set(b1[0])

    # fused head first layer: [128, 256]
    wh1 = jnp.concatenate([wm1, wi1, wb1, wc1, wv1], axis=1)
    bh1 = jnp.concatenate([bm1, bi1, bb1, bc1, bv1], axis=1)

    # fused (block-diagonal) head second layer: [256, 128]
    wh2 = jnp.zeros((HEAD_HIDDEN, OUT_WIDTH), jnp.float32)
    wh2 = wh2.at[0:64, 0:3].set(wm2)
    wh2 = wh2.at[64:128, 3:6].set(wi2)
    wh2 = wh2.at[128:160, 6:8].set(wb2)
    wh2 = wh2.at[160:192, 8:9].set(wc2)
    wh2 = wh2.at[192:256, 9:10].set(wv2)

    bh2 = jnp.zeros((1, OUT_WIDTH), jnp.float32)
    bh2 = bh2.at[:, 0:3].set(bm2)
    bh2 = bh2.at[:, 3:6].set(bi2)
    bh2 = bh2.at[:, 6:8].set(bb2)
    bh2 = bh2.at[:, 8:9].set(bc2)
    bh2 = bh2.at[:, 9:10].set(bv2)

    # epilogue constants: mask rows and the group-sum indicator matrix
    masks = jnp.zeros((8, OUT_WIDTH), jnp.float32)
    masks = masks.at[0, 0:3].set(1.0)            # model softmax group
    masks = masks.at[1, 3:6].set(1.0)            # intensity softmax group
    masks = masks.at[2, 0:6].set(1.0)            # union of softmax groups
    masks = masks.at[3, 6:9].set(1.0)            # sigmoid cols (binary + conf)
    masks = masks.at[4, 9].set(1.0)              # value col
    masks = masks.at[5, 0:6].set(1.0)            # pre-exp sign: +1 softmax
    masks = masks.at[5, 6:9].set(-1.0)           #               -1 sigmoid
    masks = masks.at[6, :].set(1.0)              # 1 - union(softmax)
    masks = masks.at[6, 0:6].set(0.0)

    gmat = jnp.zeros((OUT_WIDTH, OUT_WIDTH), jnp.float32)
    gmat = gmat.at[0:3, 0:3].set(1.0)            # model group -> its sum
    gmat = gmat.at[3:6, 3:6].set(1.0)            # intensity group -> its sum

    w1p, w2c, w3c, wh1c, wh2c, gmatc = (
        p.astype(param_dtype) for p in (w1p, w2, w3, wh1, wh2, gmat))
    return (w1p, w2c, b2, w3c, b3, wh1c, bh1, wh2c, bh2, masks, gmatc)


# ----------------------------------------------------------------------------
# Wrapper
# ----------------------------------------------------------------------------
def _round_up(x, m):
    return (x + m - 1) // m * m


@functools.partial(jax.jit, static_argnames=("block_batch",))
def adaptive_pizza_policy_forward(state, fused_params, *, block_batch=1024):
    """state: [batch, 13] float32 -> dict of policy outputs (as in PyTorch)."""
    batch = state.shape[0]

    # Batch tile: big enough to amortize per-step overhead, but grid >= 2
    # whenever batch > 8 so megacore (v7x) can shard the batch axis.
    if batch > 8:
        tb = min(block_batch, _round_up(pl.cdiv(batch, 2), 8))
    else:
        tb = _round_up(max(batch, 1), 8)
    grid = (pl.cdiv(batch, tb),)

    # Only the 13 -> 16 feature pad is materialized (no batch padding: ragged
    # last block is handled by Pallas). Column 13 = 1.0 carries the folded b1.
    x = jnp.concatenate(
        [state.astype(jnp.float32),
         jnp.ones((batch, 1), jnp.float32),
         jnp.zeros((batch, STATE_DIM_PAD - STATE_DIM - 1), jnp.float32)],
        axis=1)

    x_spec = pl.BlockSpec((tb, STATE_DIM_PAD), lambda i: (i, 0))
    out_spec = pl.BlockSpec((tb, OUT_WIDTH), lambda i: (i, 0))
    # Weights/constants as full blocks with a constant index_map: VMEM-resident
    # across grid iterations (no per-step re-DMA).
    w_specs = [pl.BlockSpec(p.shape, lambda i: (0, 0)) for p in fused_params]

    # Right-sized VMEM limit: weights (x2 pipeline bufs) + double-buffered I/O
    # tiles + live-activation estimate + headroom; capped at 48 MiB for v7x.
    weight_bytes = 2 * sum(int(p.size) * p.dtype.itemsize for p in fused_params)
    io_bytes = 2 * tb * (STATE_DIM_PAD * 4 + OUT_WIDTH * 2)
    act_bytes = tb * (3 * HIDDEN_DIM + HEAD_HIDDEN + 4 * OUT_WIDTH) * 4
    vmem_limit = int(min(weight_bytes + io_bytes + act_bytes + (8 << 20), 48 << 20))

    out = pl.pallas_call(
        _policy_kernel,
        out_shape=jax.ShapeDtypeStruct((batch, OUT_WIDTH), jnp.bfloat16),
        grid=grid,
        in_specs=[x_spec] + w_specs,
        out_specs=out_spec,
        compiler_params=pltpu.CompilerParams(
            dimension_semantics=("parallel",),
            vmem_limit_bytes=vmem_limit,
        ),
    )(x, *fused_params)

    # NOTE: bandwidth-sensitive consumers can take the [batch, 128] bf16 slab
    # directly instead of these 5 slices.
    slab = out.astype(jnp.float32)
    return {
        "model_probs": slab[:, 0:3],
        "intensity_probs": slab[:, 3:6],
        "binary_decisions": slab[:, 6:8],
        "confidence_threshold": slab[:, 8:9],
        "state_value": slab[:, 9:10],
    }


# ----------------------------------------------------------------------------
# Pure-JAX reference (for self-check)
# ----------------------------------------------------------------------------
def _reference_forward(state, params):
    (w1, b1, w2, b2, w3, b3,
     wm1, bm1, wm2, bm2,
     wi1, bi1, wi2, bi2,
     wb1, bb1, wb2, bb2,
     wc1, bc1, wc2, bc2,
     wv1, bv1, wv2, bv2) = params

    def lin(h, w, b):
        return h @ w + b

    h = state
    h = jax.nn.relu(lin(h, w1, b1))
    h = jax.nn.relu(lin(h, w2, b2))
    h = jax.nn.relu(lin(h, w3, b3))

    def head(h, wa, ba, wb, bb):
        return lin(jax.nn.relu(lin(h, wa, ba)), wb, bb)

    return {
        "model_probs": jax.nn.softmax(head(h, wm1, bm1, wm2, bm2), axis=-1),
        "intensity_probs": jax.nn.softmax(head(h, wi1, bi1, wi2, bi2), axis=-1),
        "binary_decisions": jax.nn.sigmoid(head(h, wb1, bb1, wb2, bb2)),
        "confidence_threshold": jax.nn.sigmoid(head(h, wc1, bc1, wc2, bc2)),
        "state_value": head(h, wv1, bv1, wv2, bv2),
    }


# ----------------------------------------------------------------------------
# Main
# ----------------------------------------------------------------------------
if __name__ == "__main__":
    key = jax.random.PRNGKey(0)
    k_params, k_state = jax.random.split(key)

    params = init_policy_params(k_params)
    fused = fuse_params(params)          # bf16 weights, f32 biases/masks

    # batch=16 (even grid of 2) and batch=19 (ragged last block) smoke tests.
    for batch in (16, 19):
        k_state, sub = jax.random.split(k_state)
        state = jax.random.uniform(sub, (batch, STATE_DIM), jnp.float32, 0.0, 1.0)

        outputs = adaptive_pizza_policy_forward(state, fused)
        outputs = jax.block_until_ready(outputs)

        # Tolerance accounts for bf16 weights/activations/output (f32 accumulate);
        # the epilogue itself is exact (no approx reciprocals).
        ref = _reference_forward(state, params)
        for name in outputs:
            if not jnp.allclose(outputs[name], ref[name], atol=3e-2, rtol=3e-2):
                raise AssertionError(f"mismatch in {name} (batch={batch})")

    print("KERNEL_OK")
</pallas_src>

<mosaic_0001>
module attributes {stable_mosaic.version = 11 : i64} {
  func.func @_policy_kernel(%arg0: i32, %arg1: memref<8x16xf32, #tpu.memory_space<vmem>>, %arg2: memref<16x128xbf16, #tpu.memory_space<vmem>>, %arg3: memref<128x128xbf16, #tpu.memory_space<vmem>>, %arg4: memref<1x128xf32, #tpu.memory_space<vmem>>, %arg5: memref<128x128xbf16, #tpu.memory_space<vmem>>, %arg6: memref<1x128xf32, #tpu.memory_space<vmem>>, %arg7: memref<128x256xbf16, #tpu.memory_space<vmem>>, %arg8: memref<1x256xf32, #tpu.memory_space<vmem>>, %arg9: memref<256x128xbf16, #tpu.memory_space<vmem>>, %arg10: memref<1x128xf32, #tpu.memory_space<vmem>>, %arg11: memref<8x128xf32, #tpu.memory_space<vmem>>, %arg12: memref<128x128xbf16, #tpu.memory_space<vmem>>, %arg13: memref<8x128xbf16, #tpu.memory_space<vmem>>) attributes {dimension_semantics = [#tpu.dimension_semantics<parallel>], iteration_bounds = array<i64: 2>, scalar_prefetch = 0 : i64, scratch_operands = 0 : i64, tpu.core_type = #tpu.core_type<tc>, window_params = [{transform_indices = @transform_0, window_bounds = array<i64: 8, 16>}, {pipeline_mode = #tpu.pipeline_mode<synchronous>, transform_indices = @transform_1, window_bounds = array<i64: 16, 128>}, {pipeline_mode = #tpu.pipeline_mode<synchronous>, transform_indices = @transform_2, window_bounds = array<i64: 128, 128>}, {pipeline_mode = #tpu.pipeline_mode<synchronous>, transform_indices = @transform_3, window_bounds = array<i64: 1, 128>}, {pipeline_mode = #tpu.pipeline_mode<synchronous>, transform_indices = @transform_4, window_bounds = array<i64: 128, 128>}, {pipeline_mode = #tpu.pipeline_mode<synchronous>, transform_indices = @transform_5, window_bounds = array<i64: 1, 128>}, {pipeline_mode = #tpu.pipeline_mode<synchronous>, transform_indices = @transform_6, window_bounds = array<i64: 128, 256>}, {pipeline_mode = #tpu.pipeline_mode<synchronous>, transform_indices = @transform_7, window_bounds = array<i64: 1, 256>}, {pipeline_mode = #tpu.pipeline_mode<synchronous>, transform_indices = @transform_8, window_bounds = array<i64: 256, 128>}, {pipeline_mode = #tpu.pipeline_mode<synchronous>, transform_indices = @transform_9, window_bounds = array<i64: 1, 128>}, {pipeline_mode = #tpu.pipeline_mode<synchronous>, transform_indices = @transform_10, window_bounds = array<i64: 8, 128>}, {pipeline_mode = #tpu.pipeline_mode<synchronous>, transform_indices = @transform_11, window_bounds = array<i64: 128, 128>}, {transform_indices = @transform_12, window_bounds = array<i64: 8, 128>}]} {
    %c0 = arith.constant 0 : index
    %c0_0 = arith.constant 0 : index
    %0 = vector.load %arg1[%c0, %c0_0] : memref<8x16xf32, #tpu.memory_space<vmem>>, vector<8x16xf32>
    %1 = arith.truncf %0 : vector<8x16xf32> to vector<8x16xbf16>
    %c0_1 = arith.constant 0 : index
    %c0_2 = arith.constant 0 : index
    %2 = vector.load %arg2[%c0_1, %c0_2] : memref<16x128xbf16, #tpu.memory_space<vmem>>, vector<16x128xbf16>
    %cst = arith.constant dense<0.000000e+00> : vector<8x128xf32>
    %3 = tpu.matmul %1, %2, %cst {dimension_numbers = #tpu.dot_dimension_numbers<[1], [0], [0], [1], [0, 0, 1, 1], [], []>} : vector<8x16xbf16>, vector<16x128xbf16>, vector<8x128xf32> -> vector<8x128xf32>
    %cst_3 = arith.constant 0.000000e+00 : f32
    %4 = vector.broadcast %cst_3 : f32 to vector<8x128xf32>
    %5 = arith.maximumf %3, %4 : vector<8x128xf32>
    %c0_4 = arith.constant 0 : index
    %c0_5 = arith.constant 0 : index
    %6 = vector.load %arg3[%c0_4, %c0_5] : memref<128x128xbf16, #tpu.memory_space<vmem>>, vector<128x128xbf16>
    %7 = arith.truncf %5 : vector<8x128xf32> to vector<8x128xbf16>
    %cst_6 = arith.constant dense<0.000000e+00> : vector<8x128xf32>
    %8 = tpu.matmul %7, %6, %cst_6 {dimension_numbers = #tpu.dot_dimension_numbers<[1], [0], [0], [1], [0, 0, 1, 1], [], []>} : vector<8x128xbf16>, vector<128x128xbf16>, vector<8x128xf32> -> vector<8x128xf32>
    %c0_7 = arith.constant 0 : index
    %c0_8 = arith.constant 0 : index
    %9 = vector.load %arg4[%c0_7, %c0_8] : memref<1x128xf32, #tpu.memory_space<vmem>>, vector<1x128xf32>
    %10 = vector.broadcast %9 : vector<1x128xf32> to vector<8x128xf32>
    %11 = arith.addf %8, %10 : vector<8x128xf32>
    %cst_9 = arith.constant 0.000000e+00 : f32
    %12 = vector.broadcast %cst_9 : f32 to vector<8x128xf32>
    %13 = arith.maximumf %11, %12 : vector<8x128xf32>
    %c0_10 = arith.constant 0 : index
    %c0_11 = arith.constant 0 : index
    %14 = vector.load %arg5[%c0_10, %c0_11] : memref<128x128xbf16, #tpu.memory_space<vmem>>, vector<128x128xbf16>
    %15 = arith.truncf %13 : vector<8x128xf32> to vector<8x128xbf16>
    %cst_12 = arith.constant dense<0.000000e+00> : vector<8x128xf32>
    %16 = tpu.matmul %15, %14, %cst_12 {dimension_numbers = #tpu.dot_dimension_numbers<[1], [0], [0], [1], [0, 0, 1, 1], [], []>} : vector<8x128xbf16>, vector<128x128xbf16>, vector<8x128xf32> -> vector<8x128xf32>
    %c0_13 = arith.constant 0 : index
    %c0_14 = arith.constant 0 : index
    %17 = vector.load %arg6[%c0_13, %c0_14] : memref<1x128xf32, #tpu.memory_space<vmem>>, vector<1x128xf32>
    %18 = vector.broadcast %17 : vector<1x128xf32> to vector<8x128xf32>
    %19 = arith.addf %16, %18 : vector<8x128xf32>
    %cst_15 = arith.constant 0.000000e+00 : f32
    %20 = vector.broadcast %cst_15 : f32 to vector<8x128xf32>
    %21 = arith.maximumf %19, %20 : vector<8x128xf32>
    %c0_16 = arith.constant 0 : index
    %c0_17 = arith.constant 0 : index
    %22 = vector.load %arg7[%c0_16, %c0_17] : memref<128x256xbf16, #tpu.memory_space<vmem>>, vector<128x256xbf16>
    %23 = arith.truncf %21 : vector<8x128xf32> to vector<8x128xbf16>
    %cst_18 = arith.constant dense<0.000000e+00> : vector<8x256xf32>
    %24 = tpu.matmul %23, %22, %cst_18 {dimension_numbers = #tpu.dot_dimension_numbers<[1], [0], [0], [1], [0, 0, 1, 1], [], []>} : vector<8x128xbf16>, vector<128x256xbf16>, vector<8x256xf32> -> vector<8x256xf32>
    %c0_19 = arith.constant 0 : index
    %c0_20 = arith.constant 0 : index
    %25 = vector.load %arg8[%c0_19, %c0_20] : memref<1x256xf32, #tpu.memory_space<vmem>>, vector<1x256xf32>
    %26 = vector.broadcast %25 : vector<1x256xf32> to vector<8x256xf32>
    %27 = arith.addf %24, %26 : vector<8x256xf32>
    %cst_21 = arith.constant 0.000000e+00 : f32
    %28 = vector.broadcast %cst_21 : f32 to vector<8x256xf32>
    %29 = arith.maximumf %27, %28 : vector<8x256xf32>
    %c0_22 = arith.constant 0 : index
    %c0_23 = arith.constant 0 : index
    %30 = vector.load %arg9[%c0_22, %c0_23] : memref<256x128xbf16, #tpu.memory_space<vmem>>, vector<256x128xbf16>
    %31 = arith.truncf %29 : vector<8x256xf32> to vector<8x256xbf16>
    %cst_24 = arith.constant dense<0.000000e+00> : vector<8x128xf32>
    %32 = tpu.matmul %31, %30, %cst_24 {dimension_numbers = #tpu.dot_dimension_numbers<[1], [0], [0], [1], [0, 0, 1, 1], [], []>} : vector<8x256xbf16>, vector<256x128xbf16>, vector<8x128xf32> -> vector<8x128xf32>
    %c0_25 = arith.constant 0 : index
    %c0_26 = arith.constant 0 : index
    %33 = vector.load %arg10[%c0_25, %c0_26] : memref<1x128xf32, #tpu.memory_space<vmem>>, vector<1x128xf32>
    %34 = vector.broadcast %33 : vector<1x128xf32> to vector<8x128xf32>
    %35 = arith.addf %32, %34 : vector<8x128xf32>
    %c0_27 = arith.constant 0 : index
    %c0_28 = arith.constant 0 : index
    %36 = vector.load %arg11[%c0_27, %c0_28] : memref<8x128xf32, #tpu.memory_space<vmem>>, vector<1x128xf32>
    %c1 = arith.constant 1 : index
    %c0_29 = arith.constant 0 : index
    %37 = vector.load %arg11[%c1, %c0_29] : memref<8x128xf32, #tpu.memory_space<vmem>>, vector<1x128xf32>
    %c2 = arith.constant 2 : index
    %c0_30 = arith.constant 0 : index
    %38 = vector.load %arg11[%c2, %c0_30] : memref<8x128xf32, #tpu.memory_space<vmem>>, vector<1x128xf32>
    %c3 = arith.constant 3 : index
    %c0_31 = arith.constant 0 : index
    %39 = vector.load %arg11[%c3, %c0_31] : memref<8x128xf32, #tpu.memory_space<vmem>>, vector<1x128xf32>
    %c4 = arith.constant 4 : index
    %c0_32 = arith.constant 0 : index
    %40 = vector.load %arg11[%c4, %c0_32] : memref<8x128xf32, #tpu.memory_space<vmem>>, vector<1x128xf32>
    %c5 = arith.constant 5 : index
    %c0_33 = arith.constant 0 : index
    %41 = vector.load %arg11[%c5, %c0_33] : memref<8x128xf32, #tpu.memory_space<vmem>>, vector<1x128xf32>
    %c6 = arith.constant 6 : index
    %c0_34 = arith.constant 0 : index
    %42 = vector.load %arg11[%c6, %c0_34] : memref<8x128xf32, #tpu.memory_space<vmem>>, vector<1x128xf32>
    %cst_35 = arith.constant 0.000000e+00 : f32
    %43 = vector.broadcast %cst_35 : f32 to vector<1x128xf32>
    %44 = arith.cmpf ogt, %36, %43 : vector<1x128xf32>
    %cst_36 = arith.constant -1.000000e+30 : f32
    %45 = vector.shape_cast %44 : vector<1x128xi1> to vector<1x128xi1>
    %46 = vector.broadcast %45 : vector<1x128xi1> to vector<8x128xi1>
    %47 = vector.broadcast %cst_36 : f32 to vector<8x128xf32>
    %48 = arith.select %46, %35, %47 : vector<8x128xi1>, vector<8x128xf32>
    %cst_37 = arith.constant dense<0xFF800000> : vector<8xf32>
    %49 = vector.multi_reduction <maximumf>, %48, %cst_37 [1] : vector<8x128xf32> to vector<8xf32>
    %50 = vector.shape_cast %49 : vector<8xf32> to vector<8x1xf32>
    %cst_38 = arith.constant 0.000000e+00 : f32
    %51 = vector.broadcast %cst_38 : f32 to vector<1x128xf32>
    %52 = arith.cmpf ogt, %37, %51 : vector<1x128xf32>
    %cst_39 = arith.constant -1.000000e+30 : f32
    %53 = vector.shape_cast %52 : vector<1x128xi1> to vector<1x128xi1>
    %54 = vector.broadcast %53 : vector<1x128xi1> to vector<8x128xi1>
    %55 = vector.broadcast %cst_39 : f32 to vector<8x128xf32>
    %56 = arith.select %54, %35, %55 : vector<8x128xi1>, vector<8x128xf32>
    %cst_40 = arith.constant dense<0xFF800000> : vector<8xf32>
    %57 = vector.multi_reduction <maximumf>, %56, %cst_40 [1] : vector<8x128xf32> to vector<8xf32>
    %58 = vector.shape_cast %57 : vector<8xf32> to vector<8x1xf32>
    %59 = vector.broadcast %36 : vector<1x128xf32> to vector<8x128xf32>
    %60 = vector.broadcast %50 : vector<8x1xf32> to vector<8x128xf32>
    %61 = arith.mulf %59, %60 : vector<8x128xf32>
    %62 = vector.broadcast %37 : vector<1x128xf32> to vector<8x128xf32>
    %63 = vector.broadcast %58 : vector<8x1xf32> to vector<8x128xf32>
    %64 = arith.mulf %62, %63 : vector<8x128xf32>
    %65 = arith.addf %61, %64 : vector<8x128xf32>
    %66 = vector.broadcast %41 : vector<1x128xf32> to vector<8x128xf32>
    %67 = arith.mulf %66, %35 : vector<8x128xf32>
    %68 = arith.subf %67, %65 : vector<8x128xf32>
    %69 = math.exp %68 : vector<8x128xf32>
    %70 = vector.broadcast %38 : vector<1x128xf32> to vector<8x128xf32>
    %71 = arith.mulf %70, %69 : vector<8x128xf32>
    %72 = arith.truncf %71 : vector<8x128xf32> to vector<8x128xbf16>
    %c0_41 = arith.constant 0 : index
    %c0_42 = arith.constant 0 : index
    %73 = vector.load %arg12[%c0_41, %c0_42] : memref<128x128xbf16, #tpu.memory_space<vmem>>, vector<128x128xbf16>
    %cst_43 = arith.constant dense<0.000000e+00> : vector<8x128xf32>
    %74 = tpu.matmul %72, %73, %cst_43 {dimension_numbers = #tpu.dot_dimension_numbers<[1], [0], [0], [1], [0, 0, 1, 1], [], []>} : vector<8x128xbf16>, vector<128x128xbf16>, vector<8x128xf32> -> vector<8x128xf32>
    %75 = vector.broadcast %39 : vector<1x128xf32> to vector<8x128xf32>
    %76 = arith.addf %71, %75 : vector<8x128xf32>
    %77 = vector.broadcast %40 : vector<1x128xf32> to vector<8x128xf32>
    %78 = arith.mulf %77, %35 : vector<8x128xf32>
    %79 = arith.addf %76, %78 : vector<8x128xf32>
    %80 = vector.broadcast %39 : vector<1x128xf32> to vector<8x128xf32>
    %81 = arith.mulf %80, %69 : vector<8x128xf32>
    %82 = arith.addf %74, %81 : vector<8x128xf32>
    %83 = vector.broadcast %42 : vector<1x128xf32> to vector<8x128xf32>
    %84 = arith.addf %82, %83 : vector<8x128xf32>
    %85 = arith.divf %79, %84 : vector<8x128xf32>
    %86 = arith.truncf %85 : vector<8x128xf32> to vector<8x128xbf16>
    %c0_44 = arith.constant 0 : index
    %c0_45 = arith.constant 0 : index
    %87 = vector.load %arg13[%c0_44, %c0_45] : memref<8x128xbf16, #tpu.memory_space<vmem>>, vector<8x128xbf16>
    tpu.vector_store %arg13[%c0_44, %c0_45], %86 {strides = array<i32>} : memref<8x128xbf16, #tpu.memory_space<vmem>>, vector<8x128xbf16>,
    return
  }
  func.func @transform_0(%arg0: i32) -> (i32, i32) {
    %c0_i32 = arith.constant 0 : i32
    %c0_i32_0 = arith.constant 0 : i32
    return %arg0, %c0_i32 : i32, i32
  }
  func.func @transform_1(%arg0: i32) -> (i32, i32) {
    %c0_i32 = arith.constant 0 : i32
    %c0_i32_0 = arith.constant 0 : i32
    %c0_i32_1 = arith.constant 0 : i32
    return %c0_i32, %c0_i32_0 : i32, i32
  }
  func.func @transform_2(%arg0: i32) -> (i32, i32) {
    %c0_i32 = arith.constant 0 : i32
    %c0_i32_0 = arith.constant 0 : i32
    %c0_i32_1 = arith.constant 0 : i32
    return %c0_i32, %c0_i32_0 : i32, i32
  }
  func.func @transform_3(%arg0: i32) -> (i32, i32) {
    %c0_i32 = arith.constant 0 : i32
    %c0_i32_0 = arith.constant 0 : i32
    %c0_i32_1 = arith.constant 0 : i32
    return %c0_i32, %c0_i32_0 : i32, i32
  }
  func.func @transform_4(%arg0: i32) -> (i32, i32) {
    %c0_i32 = arith.constant 0 : i32
    %c0_i32_0 = arith.constant 0 : i32
    %c0_i32_1 = arith.constant 0 : i32
    return %c0_i32, %c0_i32_0 : i32, i32
  }
  func.func @transform_5(%arg0: i32) -> (i32, i32) {
    %c0_i32 = arith.constant 0 : i32
    %c0_i32_0 = arith.constant 0 : i32
    %c0_i32_1 = arith.constant 0 : i32
    return %c0_i32, %c0_i32_0 : i32, i32
  }
  func.func @transform_6(%arg0: i32) -> (i32, i32) {
    %c0_i32 = arith.constant 0 : i32
    %c0_i32_0 = arith.constant 0 : i32
    %c0_i32_1 = arith.constant 0 : i32
    return %c0_i32, %c0_i32_0 : i32, i32
  }
  func.func @transform_7(%arg0: i32) -> (i32, i32) {
    %c0_i32 = arith.constant 0 : i32
    %c0_i32_0 = arith.constant 0 : i32
    %c0_i32_1 = arith.constant 0 : i32
    return %c0_i32, %c0_i32_0 : i32, i32
  }
  func.func @transform_8(%arg0: i32) -> (i32, i32) {
    %c0_i32 = arith.constant 0 : i32
    %c0_i32_0 = arith.constant 0 : i32
    %c0_i32_1 = arith.constant 0 : i32
    return %c0_i32, %c0_i32_0 : i32, i32
  }
  func.func @transform_9(%arg0: i32) -> (i32, i32) {
    %c0_i32 = arith.constant 0 : i32
    %c0_i32_0 = arith.constant 0 : i32
    %c0_i32_1 = arith.constant 0 : i32
    return %c0_i32, %c0_i32_0 : i32, i32
  }
  func.func @transform_10(%arg0: i32) -> (i32, i32) {
    %c0_i32 = arith.constant 0 : i32
    %c0_i32_0 = arith.constant 0 : i32
    %c0_i32_1 = arith.constant 0 : i32
    return %c0_i32, %c0_i32_0 : i32, i32
  }
  func.func @transform_11(%arg0: i32) -> (i32, i32) {
    %c0_i32 = arith.constant 0 : i32
    %c0_i32_0 = arith.constant 0 : i32
    %c0_i32_1 = arith.constant 0 : i32
    return %c0_i32, %c0_i32_0 : i32, i32
  }
  func.func @transform_12(%arg0: i32) -> (i32, i32) {
    %c0_i32 = arith.constant 0 : i32
    %c0_i32_0 = arith.constant 0 : i32
    return %arg0, %c0_i32 : i32, i32
  }
}

</mosaic_0001>

<bundles_post_ra>
// kernel: adaptive_pizza_policy_forward.1
= control target key start
LH: loop header
LB: loop body
LE: loop exit
PB: predicated region body
PF: predicated region fallthrough
CT: control target
= control target key end

     0   :  { %17 = vsyncpa [#allocation3], 0  ;;  %s2138_s0 = inlined_call_operand.vmem [shape: f32[16,16], index: 0, kind: input, shape index: {}]   ;;  %s2139_s1 = inlined_call_operand.vmem [shape: bf16[16,128], index: 1, kind: input, shape index: {}]   ;;  %s2140_s2 = inlined_call_operand.hbm [shape: bf16[128,128], index: 2, kind: input, shape index: {}]   ;;  %s2141_s3 = inlined_call_operand.vmem [shape: f32[1,128], index: 3, kind: input, shape index: {}]   ;;  %s2142_s4 = inlined_call_operand.hbm [shape: bf16[128,128], index: 4, kind: input, shape index: {}]   ;;  %s2143_s5 = inlined_call_operand.vmem [shape: f32[1,128], index: 5, kind: input, shape index: {}]   ;;  %s2144_s6 = inlined_call_operand.hbm [shape: bf16[128,256], index: 6, kind: input, shape index: {}]   ;;  %s2145_s7 = inlined_call_operand.vmem [shape: f32[1,256], index: 7, kind: input, shape index: {}]   ;;  %s2146_s8 = inlined_call_operand.hbm [shape: bf16[256,128], index: 8, kind: input, shape index: {}]   ;;  %s2147_s9 = inlined_call_operand.vmem [shape: f32[1,128], index: 9, kind: input, shape index: {}]   ;;  %s2148_s10 = inlined_call_operand.vmem [shape: f32[8,128], index: 10, kind: input, shape index: {}]   ;;  %s2149_s11 = inlined_call_operand.hbm [shape: bf16[128,128], index: 11, kind: input, shape index: {}]   ;;  %s2150_s12 = inlined_call_operand.vmem [shape: bf16[16,128], index: 12, kind: output, shape index: {}]  }
   0x1   :  { %18 = vsyncpa [#allocation5], 0 }
   0x2   :  { %19 = vsyncpa [#allocation8], 0  ;;  %s1937_s21 = smov 0  }
   0x3 LB: > { %s1943_s22 = sadd.s32 4294967295, %s1858_s21   ;;  %p1375_p0 = scmp.ge.s32.totalorder %s1858_s21, 1  ;;  %s1858_s21 = sphi %s1937_s21, %s25_s21  }
   0x4   : > { %p313_p1 = scmp.lt.s32.totalorder %s1858_s21, 3  ;;  %p1611_p2 = scmp.eq.s32.totalorder %s1943_s22, 0 }
   0x5   : > { %s1860_s24 = smov [#allocation4]   ;;  %s1861_s26 = smov [#allocation7]  }
   0x6   : > { %p1948_p3 = pnand %p1375_p0, %p313_p1  ;;  %s344_s25 = sshll.u32 %s1860_s24, 4  ;;  %s345_s25 = int_to_ptr.vmem [resolvable:$true] %s344_s25 }
   0x7   : > { %s376_s27 = sshll.u32 %s1861_s26, 4  ;;  %s1862_s29 = smov [#allocation2]   ;;  %s1954_s27 = int_to_ptr.vmem [resolvable:$true] %s376_s27 }
   0x8   : > { %p1595_p4 = pneg %p1948_p3  ;;  %s328_s30 = sshll.u32 %s1862_s29, 4  ;;  %s1962_s30 = int_to_ptr.vmem [resolvable:$true] %s328_s30 }
   0x9   : > { %s1863_s13 = smov [#allocation6]   ;;  %s1721_s16 = scalar_lea.vmem %s345_s25, 1024 }
   0xa   : > { %p1958_p5 = pnand %p1611_p2, %p1595_p4  ;;  %s1964_s14 = sshll.u32 %s1863_s13, 4  ;;  %s361_s14 = int_to_ptr.vmem [resolvable:$true] %s1964_s14 }
   0xb   : > { %p1722_p7 = scmp.ne.s32.totalorder %s345_s25, %s1721_s16  ;;  %p1729_p10 = scmp.lt.s32.totalorder %s345_s25, %s345_s25 }
   0xc   : > { %p1968_p6 = pneg %p1958_p5  ;;  %p1730_p11 = scmp.lt.s32.totalorder %s1721_s16, %s1721_s16 }
   0xe   : > { %p1724_p8 = pnand %p1722_p7, %p1968_p6  ;;  %p1731_p12 = por %p1730_p11, %p1729_p10 }
  0x10   : > { %p1725_p9 = pneg %p1724_p8 }
  0x12   : > { %p1732_p13 = pnand %p1731_p12, %p1725_p9 }
  0x14   : > { %1735 = shalt.err (!%p1732_p13)
}
  0x15   : > { %s1864_s17 = smov 64   ;;  %s1865_s18 = smov 4  }
  0x16   : > { %1601 = dma.hbm_to_vmem [thread:$0]  (!%p1958_p5), %s2142_s4, 1024, %s345_s25, [#allocation5], %s1864_s17, %s1864_s17, %s1865_s18  }
  0x17   : > { %s1747_s24 = scalar_lea.vmem %s1954_s27, 2048  ;;  %p1755_p7 = scmp.lt.s32.totalorder %s1954_s27, %s1954_s27 }
  0x18   : > { %p1748_p0 = scmp.ne.s32.totalorder %s1954_s27, %s1747_s24  ;;  %p1756_p8 = scmp.lt.s32.totalorder %s1747_s24, %s1747_s24 }
  0x1a   : > { %p1750_p1 = pnand %p1748_p0, %p1968_p6  ;;  %p1757_p9 = por %p1756_p8, %p1755_p7 }
  0x1c   : > { %p1751_p4 = pneg %p1750_p1 }
  0x1e   : > { %p1758_p10 = pnand %p1757_p9, %p1751_p4 }
  0x20   : > { %1761 = shalt.err (!%p1758_p10)
}
  0x21   : > { %1607 = dma.hbm_to_vmem [thread:$0]  (!%p1958_p5), %s2146_s8, 2048, %s1954_s27, [#allocation8], %s1864_s17, %s1864_s17, %s1865_s18  }
  0x22   : > { %s1773_s25 = scalar_lea.vmem %s1962_s30, 1024  ;;  %p1781_p0 = scmp.lt.s32.totalorder %s1962_s30, %s1962_s30 }
  0x23   : > { %p1774_p11 = scmp.ne.s32.totalorder %s1962_s30, %s1773_s25  ;;  %p1782_p1 = scmp.lt.s32.totalorder %s1773_s25, %s1773_s25 }
  0x25   : > { %p1776_p12 = pnand %p1774_p11, %p1968_p6  ;;  %p1783_p4 = por %p1782_p1, %p1781_p0 }
  0x27   : > { %p1777_p13 = pneg %p1776_p12 }
  0x29   : > { %p1784_p7 = pnand %p1783_p4, %p1777_p13 }
  0x2b   : > { %1787 = shalt.err (!%p1784_p7)
}
  0x2c   : > { %1598 = dma.hbm_to_vmem [thread:$0]  (!%p1958_p5), %s2140_s2, 1024, %s1962_s30, [#allocation3], %s1864_s17, %s1864_s17, %s1865_s18  }
  0x2d   : > { %s1799_s27 = scalar_lea.vmem %s361_s14, 2048  ;;  %p1807_p11 = scmp.lt.s32.totalorder %s361_s14, %s361_s14 }
  0x2e   : > { %p1800_p8 = scmp.ne.s32.totalorder %s361_s14, %s1799_s27  ;;  %p1808_p12 = scmp.lt.s32.totalorder %s1799_s27, %s1799_s27 }
  0x30   : > { %p1802_p9 = pnand %p1800_p8, %p1968_p6  ;;  %p1809_p13 = por %p1808_p12, %p1807_p11 }
  0x32   : > { %p1803_p10 = pneg %p1802_p9 }
  0x34   : > { %p1810_p0 = pnand %p1809_p13, %p1803_p10 }
  0x36   : > { %1813 = shalt.err (!%p1810_p0)
}
  0x37   : > { %s1866_s19 = smov 128   ;;  %s1867_s20 = smov 8  }
  0x38   : > { %1604 = dma.hbm_to_vmem [thread:$0]  (!%p1958_p5), %s2144_s6, 2048, %s361_s14, [#allocation5], %s1866_s19, %s1866_s19, %s1867_s20  }
  0x39   : > { %s1868_s30 = smov [#allocation9]  }
  0x3a   : > { %s395_s29 = sshll.u32 %s1868_s30, 4  ;;  %s396_s29 = int_to_ptr.vmem [resolvable:$true] %s395_s29 }
  0x3b   : > { %s1825_s25 = scalar_lea.vmem %s396_s29, 1024  ;;  %p1833_p8 = scmp.lt.s32.totalorder %s396_s29, %s396_s29 }
  0x3c   : > { %p1826_p1 = scmp.ne.s32.totalorder %s396_s29, %s1825_s25  ;;  %p1834_p9 = scmp.lt.s32.totalorder %s1825_s25, %s1825_s25 }
  0x3e   : > { %p1828_p4 = pnand %p1826_p1, %p1968_p6  ;;  %p1835_p10 = por %p1834_p9, %p1833_p8 }
  0x40   : > { %p1829_p7 = pneg %p1828_p4 }
  0x42   : > { %p1836_p11 = pnand %p1835_p10, %p1829_p7 }
  0x44   : > { %1839 = shalt.err (!%p1836_p11)
}
  0x45   : > { %1610 = dma.hbm_to_vmem [thread:$0]  (!%p1958_p5), %s2149_s11, 1024, %s396_s29, [#allocation8], %s1864_s17, %s1864_s17, %s1865_s18  }
  0x46   : > { %418 = sbr.rel (%p1948_p3) target bundleno = 1469 (0x5bd), region = 68 }
  0x4b   : > { %1845 = dma.done.wait (%p1611_p2), [#allocation3], 1024  }
  0x4c   : > { %1847 = vsyncadd (%p1611_p2), [#allocation3], 4294966272 }
  0x4d   : > { %1849 = dma.done.wait (%p1611_p2), [#allocation5], 3072  }
  0x4e   : > { %1851 = vsyncadd (%p1611_p2), [#allocation5], 4294964224 }
  0x4f   : > { %1853 = dma.done.wait (%p1611_p2), [#allocation8], 3072  }
  0x50   : > { %1855 = vsyncadd (%p1611_p2), [#allocation8], 4294964224  ;;  %p474_p3 = scmp.lt.s32.totalorder %s1943_s22, 1  ;;  %v1869_v0 = vmov 0.0   ;;  %vm1870_vm0 = vmmov 0   ;;  %v1641_v1 = vld [vmem:[%s2139_s1] sm:$0xff]  }
  0x51   : > { %1509 = vmatprep.subr.bf16.mxu0 %v1869_v0  ;;  %1511 = vmatprep.mubr.msk.bf16.mxu0 %vm1870_vm0, %v1869_v0  ;;  %vm493_vm1 = vcmask 130048   ;;  %v1642_v4 = vld [vmem:[#allocation2 + $0x38] sm:$0xff]   ;;  %v1643_v5 = vld [vmem:[#allocation2 + $0x30] sm:$0xff]   ;;  %v1644_v6 = vld [vmem:[#allocation2 + $0x28] sm:$0xff]   ;;  %v1871_v50 = vmov 0  }
  0x52   : > { %s2155_s22 = smov (!%p474_p3, %s1943_s22), 1  ;;  %1515 = vmatprep.subr.bf16.mxu1 %v1869_v0  ;;  %1531 = vmatprep.mubr.msk.bf16.mxu1 %vm1870_vm0, %v1869_v0  ;;  %v1645_v7 = vld [vmem:[#allocation2 + $0x20] sm:$0xff]   ;;  %v1646_v8 = vld [vmem:[#allocation2 + $0x18] sm:$0xff]   ;;  %v1647_v9 = vld [vmem:[#allocation2 + $0x10] sm:$0xff]  }
  0x53   : > { %s1388_s23 = sshll.u32 %s2155_s22, 3  ;;  %1510 = vmatpush3.bf16.msra.mxu0 %v1641_v1  ;;  %1516 = vmatpush3.bf16.msra.mxu1 %v1642_v4  ;;  %v1648_v10 = vld [vmem:[#allocation2 + $0x8] sm:$0xff]   ;;  %v1649_v11 = vld [vmem:[#allocation2] sm:$0xff]   ;;  %v1650_v12 = vld [vmem:[#allocation4 + $0x38] sm:$0xff]   ;;  %s1389_s29 = sshll.u32 %s2155_s22, 2 }
  0x54   : > { %s477_s17 = scalar_lea.vmem %s2138_s0, %s1388_s23  ;;  %1535 = vmatprep.subr.bf16.mxu0 %v1869_v0  ;;  %1517 = vmatprep.subr.bf16.mxu1 %v1869_v0  ;;  %v1651_v13 = vld [vmem:[#allocation4 + $0x30] sm:$0xff]   ;;  %v1652_v14 = vld [vmem:[#allocation4 + $0x28] sm:$0xff]   ;;  %v1653_v15 = vld [vmem:[#allocation4 + $0x20] sm:$0xff]   ;;  %s481_s14 = scalar_lea.vmem %s2150_s12, %s1389_s29 }
  0x55   : > { %v483_v2 = vld [vmem:[%s477_s17] sm:$0xff]  ;;  %v1654_v16 = vld [vmem:[#allocation4 + $0x18] sm:$0xff]   ;;  %v1655_v17 = vld [vmem:[#allocation4 + $0x10] sm:$0xff]  }
  0x56   : > { %v484_v3 = vpack.c.bf16 %v483_v2, %v483_v2  ;;  %v1656_v24 = vld [vmem:[#allocation4 + $0x8] sm:$0xff]   ;;  %v1657_v25 = vld [vmem:[#allocation4] sm:$0xff]   ;;  %v1658_v26 = vld [vmem:[#allocation6 + $0x70] ss:$8 sps:$4 sm:$0xff]  }
  0x57   : > { %1518 = vmatpush3.bf16.msra.mxu1 %v1643_v5  ;;  %v1660_v27 = vld [vmem:[#allocation6 + $0x74] ss:$8 sps:$4 sm:$0xff]   ;;  %v1663_v28 = vld [vmem:[#allocation6 + $0x64] ss:$8 sps:$4 sm:$0xff]   ;;  %v1661_v29 = vld [vmem:[#allocation6 + $0x60] ss:$8 sps:$4 sm:$0xff]  }
  0x58   : > { %1512 = vmatmul.mubr.msk.bf16.vlgmr.msra.gmra.mxu0 %vm493_vm1, %v484_v3  ;;  %1519 = vmatprep.subr.bf16.mxu1 %v1869_v0  ;;  %v1666_v30 = vld [vmem:[#allocation6 + $0x54] ss:$8 sps:$4 sm:$0xff]   ;;  %v1664_v31 = vld [vmem:[#allocation6 + $0x50] ss:$8 sps:$4 sm:$0xff]   ;;  %v1669_v32 = vld [vmem:[#allocation6 + $0x44] ss:$8 sps:$4 sm:$0xff]  }
  0x59   : > { %1551 = vmatprep.mubr.msk.bf16.mxu0 %vm1870_vm0, %v1869_v0  ;;  %1536 = vmatpush3.bf16.msra.mxu0 %v1650_v12  ;;  %v1667_v33 = vld [vmem:[#allocation6 + $0x40] ss:$8 sps:$4 sm:$0xff]   ;;  %v1672_v34 = vld [vmem:[#allocation6 + $0x34] ss:$8 sps:$4 sm:$0xff]   ;;  %v1670_v35 = vld [vmem:[#allocation6 + $0x30] ss:$8 sps:$4 sm:$0xff]   ;;  %v783_v12 = vlaneseq }
  0x5a   : > { %1537 = vmatprep.subr.bf16.mxu0 %v1869_v0  ;;  %v1675_v36 = vld [vmem:[#allocation6 + $0x24] ss:$8 sps:$4 sm:$0xff]   ;;  %v1673_v37 = vld [vmem:[#allocation6 + $0x20] ss:$8 sps:$4 sm:$0xff]   ;;  %v1678_v38 = vld [vmem:[#allocation6 + $0x14] ss:$8 sps:$4 sm:$0xff]  }
  0x5b   : > { %1520 = vmatpush3.bf16.msra.mxu1 %v1644_v6  ;;  %v1676_v39 = vld [vmem:[#allocation6 + $0x10] ss:$8 sps:$4 sm:$0xff]   ;;  %v1392_v40 = vld [vmem:[%s2141_s3] ss:$0 sm:$0xff]  ;;  %v1681_v48 = vld [vmem:[#allocation6 + $0x4] ss:$8 sps:$4 sm:$0xff]  }
  0x5c   : > { %1521 = vmatprep.subr.bf16.mxu1 %v1869_v0  ;;  %v1679_v49 = vld [vmem:[#allocation6] ss:$8 sps:$4 sm:$0xff]   ;;  %v1682_v51 = vld [vmem:[#allocation7 + $0x78] sm:$0xff]   ;;  %v1684_v53 = vld [vmem:[#allocation7 + $0x70] sm:$0xff]  }
  0x5d   : > { %1538 = vmatpush3.bf16.msra.mxu0 %v1651_v13  ;;  %v1683_v52 = vld [vmem:[#allocation7 + $0x38] sm:$0xff]   ;;  %v1685_v54 = vld [vmem:[#allocation7 + $0x30] sm:$0xff]   ;;  %v1686_v55 = vld [vmem:[#allocation7 + $0x68] sm:$0xff]   ;;  %v784_v13 = vshrl.u32 %v783_v12, 7 }
  0x5e   : > { %1539 = vmatprep.subr.bf16.mxu0 %v1869_v0  ;;  %v1687_v56 = vld [vmem:[#allocation7 + $0x28] sm:$0xff]   ;;  %v1688_v57 = vld [vmem:[#allocation7 + $0x60] sm:$0xff]   ;;  %v1690_v59 = vld [vmem:[#allocation7 + $0x58] sm:$0xff]  }
  0x5f   : > { %1522 = vmatpush3.bf16.msra.mxu1 %v1645_v7  ;;  %v1689_v58 = vld [vmem:[#allocation7 + $0x20] sm:$0xff]   ;;  %v1691_v60 = vld [vmem:[#allocation7 + $0x18] sm:$0xff]   ;;  %v1692_v61 = vld [vmem:[#allocation7 + $0x50] sm:$0xff]  }
  0x60   : > { %1523 = vmatprep.subr.bf16.mxu1 %v1869_v0  ;;  %v1693_v62 = vld [vmem:[#allocation7 + $0x10] sm:$0xff]   ;;  %v1401_v63 = vld [vmem:[%s2143_s5] ss:$0 sm:$0xff] }
  0x61   : > { %1540 = vmatpush3.bf16.msra.mxu0 %v1652_v14  ;;  %v2088_v14 = vsub.s32 0, %v784_v13 }
  0x62   : > { %1541 = vmatprep.subr.bf16.mxu0 %v1869_v0 }
  0x63   : > { %1524 = vmatpush3.bf16.msra.mxu1 %v1646_v8  ;;  %v1694_v8 = vld [vmem:[#allocation7 + $0x48] sm:$0xff]  }
  0x64   : > { %1525 = vmatprep.subr.bf16.mxu1 %v1869_v0 }
  0x65   : > { %1542 = vmatpush3.bf16.msra.mxu0 %v1653_v15  ;;  %v781_v15 = vld [vmem:[%s2145_s7] sm:$0x3] }
  0x66   : > { %1543 = vmatprep.subr.bf16.mxu0 %v1869_v0 }
  0x67   : > { %1526 = vmatpush3.bf16.msra.mxu1 %v1647_v9  ;;  %v1695_v9 = vld [vmem:[#allocation7 + $0x8] sm:$0xff]  }
  0x68   : > { %1527 = vmatprep.subr.bf16.mxu1 %v1869_v0 }
  0x69   : > { %1544 = vmatpush3.bf16.msra.mxu0 %v1654_v16  ;;  %v789_v16 = vsub.s32 1, %v784_v13 }
  0x6a   : > { %1545 = vmatprep.subr.bf16.mxu0 %v1869_v0 }
  0x6b   : > { %1528 = vmatpush3.bf16.msra.mxu1 %v1648_v10  ;;  %v1696_v10 = vld [vmem:[#allocation7 + $0x40] sm:$0xff]  }
  0x6c   : > { %1529 = vmatprep.subr.bf16.mxu1 %v1869_v0 }
  0x6d   : > { %1546 = vmatpush3.bf16.msra.mxu0 %v1655_v17  ;;  %v786_v17 = vrot.slane %v781_v15, %v2088_v14 }
  0x6e   : > { %1547 = vmatprep.subr.bf16.mxu0 %v1869_v0 }
  0x6f   : > { %1530 = vmatpush3.bf16.msra.mxu1 %v1649_v11  ;;  %v1697_v11 = vld [vmem:[#allocation7] sm:$0xff]  }
  0x70   : > { %873 = vmatprep.subr.bf16.mxu1 %v1660_v27 }
  0x71   : > { %1548 = vmatpush3.bf16.msra.mxu0 %v1656_v24 }
  0x72   : > { %1549 = vmatprep.subr.bf16.mxu0 %v1869_v0 }
  0x75   : > { %1550 = vmatpush3.bf16.msra.mxu0 %v1657_v25 }
  0x76   : > { %1478 = vmatprep.subr.bf16.mxu0 %v1682_v51  ;;  %v1705_v51 = vld [vmem:[#allocation9] sm:$0xff]  }
 0x118   : > { %v531_v18 = vpop.f32.mrf.mxu0 }
 0x119   : > { %v537_v19 = vmax.f32 %v531_v18, 0.0  ;;  %v790_v18 = vrot.slane %v781_v15, %v789_v16 }
 0x11a   : > { %v1513_v20 = vpop.f32.mrf.mxu0 }
 0x11b   : > { %v554_v21 = vpack.c.bf16 %v537_v19, %v537_v19 }
 0x11c   : > { %v534_v22 = vpop.f32.mrf.mxu0 }
 0x11d   : > { %1532 = vmatmul.mubr.bf16.vlgmr.msra.gmra.mxu1 %v554_v21 }
 0x11e   : > { %v1514_v23 = vpop.f32.mrf.mxu0  ;;  %874 = vmatpush1.bf16.msra.mxu1 %v1658_v26  ;;  %905 = vmatprep.mubr.bf16.mxu1 %v1871_v50 }
 0x11f   : > { %875 = vmatprep.subr.bf16.mxu1 %v1663_v28 }
 0x122   : > { %876 = vmatpush1.bf16.msra.mxu1 %v1661_v29  ;;  %v1698_v29 = vld [vmem:[#allocation9 + $0x38] sm:$0xff]  }
 0x123   : > { %877 = vmatprep.subr.bf16.mxu1 %v1666_v30  ;;  %v1093_v30 = vld [vmem:[%s2148_s10] sm:$0x1] }
 0x124   : > { %vm1100_vm2 = vcmp.gt.f32.partialorder %v1093_v30, 0.0 }
 0x126   : > { %878 = vmatpush1.bf16.msra.mxu1 %v1664_v31  ;;  %v1094_v31 = vld [vmem:[%s2148_s10 + $0x1] sm:$0x1] }
 0x127   : > { %879 = vmatprep.subr.bf16.mxu1 %v1669_v32  ;;  %v1101_v32 = vsel %vm1100_vm2, 1, %v1871_v50  ;;  %vm1110_vm3 = vcmp.gt.f32.partialorder %v1094_v31, 0.0 }
 0x12a   : > { %880 = vmatpush1.bf16.msra.mxu1 %v1667_v33 }
 0x12b   : > { %881 = vmatprep.subr.bf16.mxu1 %v1672_v34  ;;  %v1105_v34 = vrot.slane %v1101_v32, %v2088_v14 }
 0x12d   : > { %vm1106_vm4 = vcmp.eq.s32.totalorder %v1105_v34, 1 }
 0x12e   : > { %882 = vmatpush1.bf16.msra.mxu1 %v1670_v35  ;;  %v1111_v35 = vsel %vm1110_vm3, 1, %v1871_v50  ;;  %v1704_v50 = vld [vmem:[#allocation9 + $0x8] sm:$0xff]  }
 0x12f   : > { %883 = vmatprep.subr.bf16.mxu1 %v1675_v36  ;;  %v1426_v36 = vld [vmem:[%s2147_s9] ss:$0 sm:$0xff] }
 0x132   : > { %884 = vmatpush1.bf16.msra.mxu1 %v1673_v37 }
 0x133   : > { %885 = vmatprep.subr.bf16.mxu1 %v1678_v38 }
 0x136   : > { %886 = vmatpush1.bf16.msra.mxu1 %v1676_v39 }
 0x137   : > { %887 = vmatprep.subr.bf16.mxu1 %v1681_v48  ;;  %v1702_v48 = vld [vmem:[#allocation9 + $0x18] sm:$0xff]  }
 0x13a   : > { %888 = vmatpush1.bf16.msra.mxu1 %v1679_v49  ;;  %v1703_v49 = vld [vmem:[#allocation9 + $0x10] sm:$0xff]  }
 0x13b   : > { %1555 = vmatprep.subr.bf16.mxu1 %v1869_v0 }
 0x1dd   : > { %v644_v41 = vpop.f32.mrf.mxu1 }
 0x1de   : > { %v645_v42 = vadd.f32 %v1392_v40, %v644_v41  ;;  %v1115_v40 = vrot.slane %v1111_v35, %v2088_v14 }
 0x1df   : > { %v1533_v43 = vpop.f32.mrf.mxu1 }
 0x1e0   : > { %v650_v44 = vmax.f32 %v645_v42, 0.0  ;;  %vm1116_vm5 = vcmp.eq.s32.totalorder %v1115_v40, 1 }
 0x1e1   : > { %v647_v45 = vpop.f32.mrf.mxu1 }
 0x1e2   : > { %v667_v46 = vpack.c.bf16 %v650_v44, %v650_v44  ;;  %v1699_v45 = vld [vmem:[#allocation9 + $0x30] sm:$0xff]  }
 0x1e3   : > { %v1534_v47 = vpop.f32.mrf.mxu1 }
 0x1e4   : > { %1552 = vmatmul.mubr.bf16.vlgmr.msra.gmra.mxu0 %v667_v46  ;;  %v1700_v46 = vld [vmem:[#allocation9 + $0x28] sm:$0xff]   ;;  %v1701_v47 = vld [vmem:[#allocation9 + $0x20] sm:$0xff]  }
 0x1e5   : > { %1479 = vmatpush3.bf16.msra.mxu0 %v1683_v52 }
 0x1e6   : > { %1480 = vmatprep.subr.bf16.mxu0 %v1684_v53  ;;  %v1123_v53 = vrot.slane %v1093_v30, %v2088_v14 }
 0x1e9   : > { %1481 = vmatpush3.bf16.msra.mxu0 %v1685_v54  ;;  %v1128_v54 = vrot.slane %v1094_v31, %v2088_v14 }
 0x1ea   : > { %1482 = vmatprep.subr.bf16.mxu0 %v1686_v55  ;;  %v1443_v55 = vld [vmem:[%s2148_s10 + $0x5] ss:$0 sm:$0xff] }
 0x1ed   : > { %1483 = vmatpush3.bf16.msra.mxu0 %v1687_v56 }
 0x1ee   : > { %1484 = vmatprep.subr.bf16.mxu0 %v1688_v57 }
 0x1f1   : > { %1485 = vmatpush3.bf16.msra.mxu0 %v1689_v58 }
 0x1f2   : > { %1486 = vmatprep.subr.bf16.mxu0 %v1690_v59 }
 0x1f5   : > { %1487 = vmatpush3.bf16.msra.mxu0 %v1691_v60 }
 0x1f6   : > { %1488 = vmatprep.subr.bf16.mxu0 %v1692_v61 }
 0x1f9   : > { %1489 = vmatpush3.bf16.msra.mxu0 %v1693_v62 }
 0x1fa   : > { %1490 = vmatprep.subr.bf16.mxu0 %v1694_v8 }
 0x1fd   : > { %1491 = vmatpush3.bf16.msra.mxu0 %v1695_v9  ;;  %v1455_v9 = vld [vmem:[%s2148_s10 + $0x6] ss:$0 sm:$0xff] }
 0x1fe   : > { %1492 = vmatprep.subr.bf16.mxu0 %v1696_v10 }
 0x201   : > { %1493 = vmatpush3.bf16.msra.mxu0 %v1697_v11 }
 0x2a4   : > { %v757_v1 = vpop.f32.mrf.mxu0 }
 0x2a5   : > { %v758_v2 = vadd.f32 %v1401_v63, %v757_v1  ;;  %v1446_v1 = vld [vmem:[%s2148_s10 + $0x4] ss:$0 sm:$0xff] }
 0x2a6   : > { %v1553_v3 = vpop.f32.mrf.mxu0 }
 0x2a7   : > { %v763_v4 = vmax.f32 %v758_v2, 0.0  ;;  %v1445_v3 = vld [vmem:[%s2148_s10 + $0x3] ss:$0 sm:$0xff] }
 0x2a8   : > { %v760_v5 = vpop.f32.mrf.mxu0 }
 0x2a9   : > { %v780_v6 = vpack.c.bf16 %v763_v4, %v763_v4 }
 0x2aa   : > { %v1554_v7 = vpop.f32.mrf.mxu0 }
 0x2ab   : > { %906 = vmatmul.mubr.bf16.vlgmr.msra.gmra.mxu1 %v780_v6 }
 0x2ac   : > { %1571 = vmatprep.mubr.msk.bf16.mxu1 %vm1870_vm0, %v1869_v0  ;;  %1556 = vmatpush3.bf16.msra.mxu1 %v1698_v29 }
 0x2ad   : > { %1557 = vmatprep.subr.bf16.mxu1 %v1869_v0 }
 0x2b0   : > { %1558 = vmatpush3.bf16.msra.mxu1 %v1699_v45 }
 0x2b1   : > { %1559 = vmatprep.subr.bf16.mxu1 %v1869_v0 }
 0x2b4   : > { %1560 = vmatpush3.bf16.msra.mxu1 %v1700_v46 }
 0x2b5   : > { %1561 = vmatprep.subr.bf16.mxu1 %v1869_v0 }
 0x2b8   : > { %1562 = vmatpush3.bf16.msra.mxu1 %v1701_v47 }
 0x2b9   : > { %1563 = vmatprep.subr.bf16.mxu1 %v1869_v0 }
 0x2bc   : > { %1564 = vmatpush3.bf16.msra.mxu1 %v1702_v48 }
 0x2bd   : > { %1565 = vmatprep.subr.bf16.mxu1 %v1869_v0 }
 0x2c0   : > { %1566 = vmatpush3.bf16.msra.mxu1 %v1703_v49 }
 0x2c1   : > { %1567 = vmatprep.subr.bf16.mxu1 %v1869_v0 }
 0x2c4   : > { %1568 = vmatpush3.bf16.msra.mxu1 %v1704_v50 }
 0x2c5   : > { %1569 = vmatprep.subr.bf16.mxu1 %v1869_v0  ;;  %v1444_v0 = vld [vmem:[%s2148_s10 + $0x2] ss:$0 sm:$0xff] }
 0x2c8   : > { %1570 = vmatpush3.bf16.msra.mxu1 %v1705_v51 }
 0x36b   : > { %v907_v19 = vpop.f32.mrf.mxu1 }
 0x36c   : > { %v908_v20 = vadd.f32 %v907_v19, %v786_v17 }
 0x36d   : > { %v909_v21 = vpop.f32.mrf.mxu1 }
 0x36e   : > { %v910_v22 = vadd.f32 %v909_v21, %v790_v18  ;;  %v914_v23 = vmax.f32 %v908_v20, 0.0 }
 0x36f   : > { %v911_v24 = vpop.f32.mrf.mxu1 }
 0x370   : > { %v915_v25 = vmax.f32 %v910_v22, 0.0  ;;  %v948_v28 = vpack.c.bf16 %v914_v23, %v914_v23 }
 0x371   : > { %v912_v26 = vpop.f32.mrf.mxu1 }
 0x372   : > { %v949_v27 = vpack.c.bf16 %v915_v25, %v915_v25 }
 0x374   : > { %1085 = vmatprep.mubr.bf16.mxu0 %v949_v27 }
 0x375   : > { %1086 = vmatmul.mubr.bf16.vlgmr.msra.gmra.mxu0 %v948_v28 }
 0x435   : > { %v1494_v33 = vpop.f32.mrf.mxu0 }
 0x437   : > { %v1495_v37 = vpop.f32.mrf.mxu0 }
 0x438   : > { %v1496_v38 = vadd.f32 %v1495_v37, %v1494_v33 }
 0x439   : > { %v1497_v39 = vpop.f32.mrf.mxu0 }
 0x43a   : > { %v1088_v41 = vadd.f32 %v1496_v38, %v1426_v36 }
 0x43b   : > { %v1498_v42 = vpop.f32.mrf.mxu0 }
 0x43c   : > { %v1107_v43 = vsel %vm1106_vm4, %v1088_v41, -1e+30  ;;  %v1117_v44 = vsel %vm1116_vm5, %v1088_v41, -1e+30  ;;  %v1135_v59 = vmul.f32 %v1443_v55, %v1088_v41  ;;  %v1170_v6 = vmul.f32 %v1446_v1, %v1088_v41 }
 0x43d   : > { %1108 = vmax.xlane.f32.xlu0 %v1107_v43 }
 0x441   : > { %1118 = vmax.xlane.f32.xlu0 %v1117_v44 }
 0x4c6   : > { %v1109_v52 = vpop.xlane.xlu0 %1108 }
 0x4c7   : > { %v1124_v57 = vmul.f32 %v1123_v53, %v1109_v52 }
 0x4ca   : > { %v1119_v56 = vpop.xlane.xlu0 %1118 }
 0x4cb   : > { %v1129_v58 = vmul.f32 %v1128_v54, %v1119_v56 }
 0x4cd   : > { %v1130_v60 = vadd.f32 %v1129_v58, %v1124_v57 }
 0x4cf   : > { %v1136_v61 = vsub.f32 %v1135_v59, %v1130_v60 }
 0x4d1   : > { %v1137_v62 = vmul.f32 1.442695, %v1136_v61 }
 0x4d3   : > { %1706 = vpow2.f32 %v1137_v62 }
 0x4e0   : > { %v1707_v63 = vpop.eup %1706 }
 0x4e1   : > { %v1143_v2 = vmul.f32 %v1707_v63, %v1444_v0  ;;  %v1172_v8 = vmul.f32 %v1707_v63, %v1445_v3 }
 0x4e3   : > { %v1144_v4 = vpack.c.bf16 %v1143_v2, %v1143_v2  ;;  %v1165_v5 = vadd.f32 %v1445_v3, %v1143_v2 }
 0x4e5   : > { %1572 = vmatmul.mubr.bf16.vlgmr.msra.gmra.mxu1 %v1144_v4  ;;  %v1171_v7 = vadd.f32 %v1170_v6, %v1165_v5 }
 0x5a5   : > { %v1255_v10 = vpop.f32.mrf.mxu1 }
 0x5a6   : > { %v1256_v11 = vadd.f32 %v1255_v10, %v1172_v8 }
 0x5a7   : > { %v1573_v12 = vpop.f32.mrf.mxu1 }
 0x5a8   : > { %v1265_v13 = vadd.f32 %v1455_v9, %v1256_v11 }
 0x5a9   : > { %v1258_v14 = vpop.f32.mrf.mxu1 }
 0x5aa   : > { %1708 = vrcp.f32 %v1265_v13 }
 0x5ab   : > { %v1574_v15 = vpop.f32.mrf.mxu1 }
 0x5b7   : > { %v1709_v16 = vpop.eup %1708 }
 0x5b8   : > { %v1267_v17 = vmul.f32 %v1709_v16, %v1171_v7 }
 0x5ba   : > { %v1268_v18 = vpack.c.bf16 %v1267_v17, %v1267_v17 }
 0x5bc   : > { %1269 = vst [vmem:[%s481_s14] sm:$0xf] %v1268_v18 }
 0x5bd PF: > { %s25_s21 = sadd.s32 1, %s1858_s21  }
 0x5be   : > { %p22_p2 = scmp.ge.s32.totalorder %s25_s21, 4  }
 0x5c0   :  { %24 = sbr.rel (!%p22_p2) target bundleno = 3 (0x3), region = 119 }
 0x5c5   :  { %1289 = vsyncpa [#allocation3], 1 }
 0x5c6   :  { %1291 = vsyncpa [#allocation3 + $0x1], 1 }
 0x5c7   :  { %1292 = vsyncpa [#allocation5], 1 }
 0x5c8   :  { %1293 = vsyncpa [#allocation8], 1 }

</bundles_post_ra>
